<compile_context>
chip_gen: v7x
topology: tpu7x:2x2x1
jax: 0.10.0
libtpu: 0.0.40
codegen_flags: <defaults>
</compile_context>

<pallas_src>
import functools

import jax
import jax.numpy as jnp
from jax.experimental import pallas as pl
from jax.experimental.pallas import tpu as pltpu

_LANE_TILE_MAX = 4096   # lanes per tile (multiple of 128)
_ROW_TILE_MAX = 256     # rows per tile (multiple of 32: safe for f32/bf16/i8)


def _vmem_budget():
    """(tile working-set budget, explicit vmem_limit_bytes), generation-aware."""
    cap = 64 << 20
    try:
        info = pltpu.get_tpu_info()
        cap = getattr(info, "vmem_capacity_bytes", cap) or cap
    except Exception:
        pass
    if cap >= (100 << 20):            # v5e / v6e: 128 MiB physical VMEM
        return 48 << 20, 96 << 20
    return 24 << 20, 40 << 20         # v7x-class: 64 MiB physical VMEM


def _choose_tiles(rows, L, itemsize, budget):
    """Pick (row_tile, n_row, lane_tile, n_lane) under the VMEM budget."""
    # Worst-case per-cell cost across both passes:
    #   apply: 2x double-buffered input + output = 4*itemsize, plus f32 temp slack.
    per_cell = 4 * itemsize + 4
    tl = L if L <= _LANE_TILE_MAX else _LANE_TILE_MAX        # full L or mult of 128
    max_rows = max(32, (budget // (per_cell * tl)) // 32 * 32)
    row_tile = min(_ROW_TILE_MAX, max_rows)
    if rows <= row_tile:
        row_tile = rows                                      # full extent: always legal
    return row_tile, pl.cdiv(rows, row_tile), tl, pl.cdiv(L, tl)


# ----------------------------- kernels ------------------------------------


def _partial_sum_kernel(x_ref, psum_ref, *, seq_len, lane_tile):
    """Per-row (b*C+c) sum over L, accumulated in the resident f32 output block."""
    i = pl.program_id(1)

    @pl.when(i == 0)
    def _():
        psum_ref[...] = jnp.zeros_like(psum_ref)

    def _accum(mask_lanes):
        x = x_ref[...].astype(jnp.float32)                   # (row_tile, tl)
        if mask_lanes:
            lane = jax.lax.broadcasted_iota(jnp.int32, x.shape, 1) + i * lane_tile
            x = jnp.where(lane < seq_len, x, 0.0)
        psum_ref[...] += jnp.sum(x, axis=-1, keepdims=True)  # XLU reduce, VPU add

    if seq_len % lane_tile:                                  # trace-time: ragged L
        last = pl.num_programs(1) - 1
        pl.when(i != last)(lambda: _accum(False))
        pl.when(i == last)(lambda: _accum(True))
    else:
        _accum(False)


def _apply_kernel(x_ref, shift_ref, o_ref):
    """out = x + shift  (shift = bias - mean, per-row, f32 broadcast over lanes)."""
    o_ref[...] = (x_ref[...].astype(jnp.float32) + shift_ref[...]).astype(o_ref.dtype)


def _fused_train_kernel(x_ref, bias_ref, o_ref, mean_ref, *, inv_count):
    """Single-pass training kernel for tensors resident in VMEM."""
    x = x_ref[...].astype(jnp.float32)                       # (B, C, L)
    s = jnp.sum(x, axis=2, keepdims=True)                    # (B, C, 1)
    mean = jnp.sum(s, axis=0, keepdims=True) * inv_count     # (1, C, 1)
    mean_ref[...] = mean
    o_ref[...] = (x + (bias_ref[...] - mean)).astype(o_ref.dtype)


# ----------------------------- wrapper -------------------------------------


def center_norm_forward(x, bias, running_mean, *, momentum=0.1, training=True,
                        frozen=False, allow_fused=True, tile_override=None):
    """x: (B, C, L); bias: (1, C, 1) or None; running_mean: (C, 1) float32."""
    B, C, L = x.shape
    rows = B * C
    itemsize = jnp.dtype(x.dtype).itemsize
    budget, limit = _vmem_budget()

    bias_f32 = (jnp.zeros((1, C, 1), jnp.float32) if bias is None
                else bias.reshape(1, C, 1).astype(jnp.float32))
    update = training and (not frozen)

    # ---- fused single-pass path: training + whole tensor fits in VMEM ----
    if update and allow_fused and B * C * L * (2 * itemsize + 8) <= budget:
        out, mean3 = pl.pallas_call(
            functools.partial(_fused_train_kernel, inv_count=1.0 / float(B * L)),
            out_shape=(jax.ShapeDtypeStruct((B, C, L), x.dtype),
                       jax.ShapeDtypeStruct((1, C, 1), jnp.float32)),
            grid_spec=pltpu.PrefetchScalarGridSpec(
                num_scalar_prefetch=0,
                grid=(1,),
                in_specs=[pl.BlockSpec((B, C, L), lambda i: (0, 0, 0)),
                          pl.BlockSpec((1, C, 1), lambda i: (0, 0, 0))],
                out_specs=[pl.BlockSpec((B, C, L), lambda i: (0, 0, 0)),
                           pl.BlockSpec((1, C, 1), lambda i: (0, 0, 0))],
            ),
            compiler_params=pltpu.CompilerParams(vmem_limit_bytes=limit),
        )(x, bias_f32)
        mean = mean3.reshape(C, 1)
        new_rm = ((1.0 - momentum) * running_mean.astype(jnp.float32)
                  + momentum * mean).astype(running_mean.dtype)
        return out, new_rm

    # ---- tiled two-pass path (row-folded (B*C, L) layout) ----
    x2 = x.reshape(rows, L)                                   # free metadata reshape
    if tile_override is not None:
        row_tile, tl = tile_override
        row_tile = min(row_tile, rows)
        tl = min(tl, L)
        n_row, n_lane = pl.cdiv(rows, row_tile), pl.cdiv(L, tl)
    else:
        row_tile, n_row, tl, n_lane = _choose_tiles(rows, L, itemsize, budget)

    if update:
        psums = pl.pallas_call(
            functools.partial(_partial_sum_kernel, seq_len=L, lane_tile=tl),
            out_shape=jax.ShapeDtypeStruct((rows, 1), jnp.float32),
            grid_spec=pltpu.PrefetchScalarGridSpec(
                num_scalar_prefetch=0,
                grid=(n_row, n_lane),
                in_specs=[pl.BlockSpec((row_tile, tl), lambda r, i: (r, i))],
                out_specs=pl.BlockSpec((row_tile, 1), lambda r, i: (r, 0)),
            ),
            compiler_params=pltpu.CompilerParams(
                dimension_semantics=("parallel", "arbitrary"),
                vmem_limit_bytes=limit),
        )(x2)
        mean = jnp.sum(psums.reshape(B, C, 1), axis=0) / float(B * L)   # (C, 1)
        new_rm = ((1.0 - momentum) * running_mean.astype(jnp.float32)
                  + momentum * mean).astype(running_mean.dtype)
    else:
        mean = running_mean.astype(jnp.float32).reshape(C, 1)
        new_rm = running_mean

    # Fold bias into a single f32 per-channel shift, broadcast to per-row.
    shift_c = bias_f32.reshape(C, 1) - mean                   # (C, 1) f32
    shift_rows = jnp.broadcast_to(shift_c[None], (B, C, 1)).reshape(rows, 1)

    out2 = pl.pallas_call(
        _apply_kernel,
        out_shape=jax.ShapeDtypeStruct((rows, L), x.dtype),
        grid_spec=pltpu.PrefetchScalarGridSpec(
            num_scalar_prefetch=0,
            grid=(n_row, n_lane),
            in_specs=[pl.BlockSpec((row_tile, tl), lambda r, i: (r, i)),
                      pl.BlockSpec((row_tile, 1), lambda r, i: (r, 0))],
            out_specs=pl.BlockSpec((row_tile, tl), lambda r, i: (r, i)),
        ),
        compiler_params=pltpu.CompilerParams(
            dimension_semantics=("parallel", "parallel"),
            vmem_limit_bytes=limit),
    )(x2, shift_rows)

    return out2.reshape(B, C, L), new_rm


if __name__ == "__main__":
    key = jax.random.PRNGKey(0)
    k0, k1 = jax.random.split(key)
    B, C, L = 2, 4, 256                     # input (B, C, L); num_features=C, dim=3
    momentum = 0.1

    x = jax.random.normal(k0, (B, C, L), dtype=jnp.float32)
    bias = jnp.zeros((1, C, 1), dtype=jnp.float32)       # CenterNorm.reset_parameters()
    running_mean = jnp.zeros((C, 1), dtype=jnp.float32)

    def ref_train(xx, bb, rm):
        xc = jnp.transpose(xx, (1, 0, 2)).reshape(xx.shape[1], -1)
        mean = jnp.mean(xc, axis=-1, keepdims=True)
        out = jnp.transpose((xc - mean).reshape(xx.shape[1], xx.shape[0], xx.shape[2]),
                            (1, 0, 2)) + bb
        return out, (1.0 - momentum) * rm + momentum * mean

    ref_o, ref_rm = ref_train(x, bias, running_mean)

    # 1) fused single-pass training path (tensor fits in VMEM)
    out_f, rm_f = center_norm_forward(x, bias, running_mean, momentum=momentum,
                                      training=True, frozen=False)
    jax.block_until_ready(out_f)
    assert jnp.allclose(out_f, ref_o, atol=1e-5, rtol=1e-5)
    assert jnp.allclose(rm_f, ref_rm, atol=1e-6, rtol=1e-6)

    # 2) tiled two-pass training path on the same inputs
    out_t, rm_t = center_norm_forward(x, bias, running_mean, momentum=momentum,
                                      training=True, frozen=False, allow_fused=False)
    jax.block_until_ready(out_t)
    assert jnp.allclose(out_t, ref_o, atol=1e-5, rtol=1e-5)
    assert jnp.allclose(rm_t, ref_rm, atol=1e-6, rtol=1e-6)

    # 3) tiled path with forced small tiles -> exercises ragged-lane masking
    L2 = 200
    x2 = jax.random.normal(k1, (B, C, L2), dtype=jnp.float32)
    ref_o2, ref_rm2 = ref_train(x2, bias, running_mean)
    out_r, rm_r = center_norm_forward(x2, bias, running_mean, momentum=momentum,
                                      training=True, frozen=False,
                                      allow_fused=False, tile_override=(8, 128))
    jax.block_until_ready(out_r)
    assert jnp.allclose(out_r, ref_o2, atol=1e-5, rtol=1e-5)
    assert jnp.allclose(rm_r, ref_rm2, atol=1e-6, rtol=1e-6)

    # 4) eval / frozen path (uses running_mean, no update)
    out_e, rm_e = center_norm_forward(x, bias, rm_f, momentum=momentum,
                                      training=False, frozen=False)
    jax.block_until_ready(out_e)
    ref_e = x - rm_f.reshape(1, C, 1) + bias
    assert jnp.allclose(out_e, ref_e, atol=1e-5, rtol=1e-5)
    assert jnp.allclose(rm_e, rm_f)

    print("KERNEL_OK")
</pallas_src>

<mosaic_0001>
module attributes {stable_mosaic.version = 11 : i64} {
  func.func @_fused_train_kernel(%arg0: i32, %arg1: memref<2x4x256xf32, #tpu.memory_space<vmem>>, %arg2: memref<1x4x1xf32, #tpu.memory_space<vmem>>, %arg3: memref<2x4x256xf32, #tpu.memory_space<vmem>>, %arg4: memref<1x4x1xf32, #tpu.memory_space<vmem>>) attributes {dimension_semantics = [#tpu.dimension_semantics<arbitrary>], iteration_bounds = array<i64: 1>, scalar_prefetch = 0 : i64, scratch_operands = 0 : i64, tpu.core_type = #tpu.core_type<tc>, window_params = [{pipeline_mode = #tpu.pipeline_mode<synchronous>, transform_indices = @transform_0, window_bounds = array<i64: 2, 4, 256>}, {pipeline_mode = #tpu.pipeline_mode<synchronous>, transform_indices = @transform_1, window_bounds = array<i64: 1, 4, 1>}, {pipeline_mode = #tpu.pipeline_mode<synchronous>, transform_indices = @transform_2, window_bounds = array<i64: 2, 4, 256>}, {pipeline_mode = #tpu.pipeline_mode<synchronous>, transform_indices = @transform_3, window_bounds = array<i64: 1, 4, 1>}]} {
    %c0 = arith.constant 0 : index
    %c0_0 = arith.constant 0 : index
    %c0_1 = arith.constant 0 : index
    %0 = vector.load %arg1[%c0, %c0_0, %c0_1] : memref<2x4x256xf32, #tpu.memory_space<vmem>>, vector<2x4x256xf32>
    %cst = arith.constant dense<0.000000e+00> : vector<2x4xf32>
    %1 = vector.multi_reduction <add>, %0, %cst [2] : vector<2x4x256xf32> to vector<2x4xf32>
    %2 = vector.shape_cast %1 : vector<2x4xf32> to vector<2x4x1xf32>
    %cst_2 = arith.constant dense<0.000000e+00> : vector<4x1xf32>
    %3 = vector.multi_reduction <add>, %2, %cst_2 [0] : vector<2x4x1xf32> to vector<4x1xf32>
    %4 = vector.shape_cast %3 : vector<4x1xf32> to vector<1x4x1xf32>
    %cst_3 = arith.constant 0.001953125 : f32
    %5 = vector.broadcast %cst_3 : f32 to vector<1x4x1xf32>
    %6 = arith.mulf %4, %5 : vector<1x4x1xf32>
    %c0_4 = arith.constant 0 : index
    %c0_5 = arith.constant 0 : index
    %c0_6 = arith.constant 0 : index
    %7 = vector.load %arg4[%c0_4, %c0_5, %c0_6] : memref<1x4x1xf32, #tpu.memory_space<vmem>>, vector<1x4x1xf32>
    tpu.vector_store %arg4[%c0_4, %c0_5, %c0_6], %6 {strides = array<i32>} : memref<1x4x1xf32, #tpu.memory_space<vmem>>, vector<1x4x1xf32>,
    %c0_7 = arith.constant 0 : index
    %c0_8 = arith.constant 0 : index
    %c0_9 = arith.constant 0 : index
    %8 = vector.load %arg2[%c0_7, %c0_8, %c0_9] : memref<1x4x1xf32, #tpu.memory_space<vmem>>, vector<1x4x1xf32>
    %9 = arith.subf %8, %6 : vector<1x4x1xf32>
    %10 = vector.broadcast %9 : vector<1x4x1xf32> to vector<2x4x256xf32>
    %11 = arith.addf %0, %10 : vector<2x4x256xf32>
    %c0_10 = arith.constant 0 : index
    %c0_11 = arith.constant 0 : index
    %c0_12 = arith.constant 0 : index
    %12 = vector.load %arg3[%c0_10, %c0_11, %c0_12] : memref<2x4x256xf32, #tpu.memory_space<vmem>>, vector<2x4x256xf32>
    tpu.vector_store %arg3[%c0_10, %c0_11, %c0_12], %11 {strides = array<i32>} : memref<2x4x256xf32, #tpu.memory_space<vmem>>, vector<2x4x256xf32>,
    return
  }
  func.func @transform_0(%arg0: i32) -> (i32, i32, i32) {
    %c0_i32 = arith.constant 0 : i32
    %c0_i32_0 = arith.constant 0 : i32
    %c0_i32_1 = arith.constant 0 : i32
    %c0_i32_2 = arith.constant 0 : i32
    return %c0_i32, %c0_i32_0, %c0_i32_1 : i32, i32, i32
  }
  func.func @transform_1(%arg0: i32) -> (i32, i32, i32) {
    %c0_i32 = arith.constant 0 : i32
    %c0_i32_0 = arith.constant 0 : i32
    %c0_i32_1 = arith.constant 0 : i32
    %c0_i32_2 = arith.constant 0 : i32
    return %c0_i32, %c0_i32_0, %c0_i32_1 : i32, i32, i32
  }
  func.func @transform_2(%arg0: i32) -> (i32, i32, i32) {
    %c0_i32 = arith.constant 0 : i32
    %c0_i32_0 = arith.constant 0 : i32
    %c0_i32_1 = arith.constant 0 : i32
    %c0_i32_2 = arith.constant 0 : i32
    return %c0_i32, %c0_i32_0, %c0_i32_1 : i32, i32, i32
  }
  func.func @transform_3(%arg0: i32) -> (i32, i32, i32) {
    %c0_i32 = arith.constant 0 : i32
    %c0_i32_0 = arith.constant 0 : i32
    %c0_i32_1 = arith.constant 0 : i32
    %c0_i32_2 = arith.constant 0 : i32
    return %c0_i32, %c0_i32_0, %c0_i32_1 : i32, i32, i32
  }
}

</mosaic_0001>

<bundles_post_ra>
// kernel: tpu_custom_call.1
= control target key start
LH: loop header
LB: loop body
LE: loop exit
PB: predicated region body
PF: predicated region fallthrough
CT: control target
= control target key end

     0   :  { %9 = vsyncpa [#allocation3], 0  ;;  %s218_s0 = inlined_call_operand.hbm [shape: f32[2,4,256], index: 0, kind: input, shape index: {}]   ;;  %s219_s1 = inlined_call_operand.vmem [shape: f32[1,4,1], index: 1, kind: input, shape index: {}]   ;;  %s220_s2 = inlined_call_operand.hbm [shape: f32[2,4,256], index: 2, kind: output, shape index: {0}]   ;;  %s221_s3 = inlined_call_operand.vmem [shape: f32[1,4,1], index: 3, kind: output, shape index: {1}]  }
   0x1   :  { %10 = vsyncpa [#allocation4], 0  ;;  %s150_s12 = smov [#allocation2]   ;;  %s102_s16 = scalar_lea.hbm %s218_s0, 256 }
   0x2   :  { %s16_s13 = sshll.u32 %s150_s12, 4  ;;  %p103_p0 = scmp.ne.s32.totalorder %s218_s0, %s102_s16  ;;  %s17_s13 = int_to_ptr.vmem [resolvable:$true] %s16_s13 }
   0x3   :  { %p106_p1 = scmp.lt.u32.totalorder %s102_s16, %s218_s0 }
   0x5   :  { %p108_p2 = pnand %p106_p1, %p103_p0 }
   0x7   :  { %111 = shalt.err (!%p108_p2)
}
   0x8   :  { %s112_s21 = scalar_lea.vmem %s17_s13, 256  ;;  %p117_p4 = scmp.lt.s32.totalorder %s17_s13, %s17_s13 }
   0x9   :  { %p113_p3 = scmp.ne.s32.totalorder %s17_s13, %s112_s21  ;;  %p118_p5 = scmp.lt.s32.totalorder %s112_s21, %s112_s21 }
   0xb   :  { %p119_p6 = por %p118_p5, %p117_p4 }
   0xd   :  { %p120_p7 = pnand %p119_p6, %p113_p3 }
   0xf   :  { %123 = shalt.err (!%p120_p7)
}
  0x10   :  { %s151_s22 = smov 128   ;;  %s152_s23 = smov 8  }
  0x11   :  { %22 = dma.hbm_to_vmem [thread:$0]  %s218_s0, 256, %s17_s13, [#allocation3], %s151_s22, %s151_s22, %s152_s23  }
  0x12   :  { %146 = dma.done.wait [#allocation3], 256  }
  0x13   :  { %147 = vsyncadd [#allocation3], 4294967040  ;;  %vm36_vm0 = vcmask 1043456   ;;  %v28_v0 = vld [vmem:[#allocation2] sm:$0xff]  ;;  %v29_v1 = vld [vmem:[#allocation2 + $0x8] sm:$0xff]  ;;  %v153_v10 = vmov 0   ;;  %v62_v21 = vlaneseq }
  0x14   :  { %v32_v2 = vcombine.high %v28_v0, %v28_v0  ;;  %v37_v3 = vsel %vm36_vm0, %v28_v0, 0.0  ;;  %v33_v4 = vcombine.high %v29_v1, %v29_v1  ;;  %v42_v6 = vsel %vm36_vm0, %v29_v1, 0.0  ;;  %98 = vset.pattern.permute.xlu1 %v153_v10  ;;  %99 = vset.pattern.permute.xlu0 %v153_v10  ;;  %v53_v16 = vld [vmem:[%s219_s1] sm:$0xf]  ;;  %s155_s29 = smov [#allocation5]  }
  0x15   :  { %vm51_vm1 = vcmask 3072   ;;  %v154_v19 = vmov 839922192   ;;  %v63_v23 = vshrl.u32 %v62_v21, 7  ;;  %s76_s30 = sshll.u32 %s155_s29, 4  ;;  %s77_s30 = int_to_ptr.vmem [resolvable:$true] %s76_s30 }
  0x16   :  { %v38_v5 = vsel %vm36_vm0, %v32_v2, 0.0  ;;  %v43_v7 = vsel %vm36_vm0, %v33_v4, 0.0  ;;  %v60_v20 = vunpack.c.l.s4 %v154_v19  ;;  %s124_s1 = scalar_lea.vmem %s77_s30, 256  ;;  %p129_p9 = scmp.lt.s32.totalorder %s77_s30, %s77_s30 }
  0x17   :  { %v39_v8 = vadd.f32 %v38_v5, %v37_v3  ;;  %v44_v9 = vadd.f32 %v43_v7, %v42_v6  ;;  %p125_p8 = scmp.ne.s32.totalorder %s77_s30, %s124_s1  ;;  %p130_p10 = scmp.lt.s32.totalorder %s124_s1, %s124_s1 }
  0x18   :  { %v61_v22 = vunpack.c.0.s8 %v60_v20 }
  0x19   :  { %40 = vadd.xlane.f32.xlu0 %v39_v8  ;;  %p131_p11 = por %p130_p10, %p129_p9 }
  0x1a   :  { %v64_v24 = vsub.s32 %v61_v22, %v63_v23 }
  0x1b   :  { %p132_p12 = pnand %p131_p11, %p125_p8 }
  0x1d   :  { %45 = vadd.xlane.f32.xlu0 %v44_v9 }
  0xa6   :  { %v41_v11 = vpop.xlane.xlu0 %40 }
  0xa7   :  { %v47_v13 = vsel %vm36_vm0, %v41_v11, 0.0 }
  0xaa   :  { %v46_v12 = vpop.xlane.xlu0 %45 }
  0xab   :  { %v48_v14 = vsel %vm36_vm0, %v46_v12, 0.0 }
  0xac   :  { %v49_v15 = vadd.f32 %v48_v14, %v47_v13 }
  0xae   :  { %v50_v17 = vmul.f32 0.001953125, %v49_v15 }
  0xb0   :  { %52 = vst.msk [vmem:[%s221_s3] sm:$0xf] %vm51_vm1, %v50_v17  ;;  %v54_v18 = vsub.f32 %v53_v16, %v50_v17 }
  0xb2   :  { %57 = vperm.xlu1 %98, %v54_v18  }
 0x131   :  { %v58_v25 = vpop.permute.xlu1 %57 }
 0x132   :  { %v65_v26 = vrot.slane %v58_v25, %v64_v24 }
 0x134   :  { %v67_v27 = vadd.f32 %v65_v26, %v28_v0  ;;  %v68_v28 = vadd.f32 %v65_v26, %v29_v1 }
 0x136   :  { %69 = vst [vmem:[#allocation5] sm:$0xff] %v67_v27  ;;  %70 = vst [vmem:[#allocation5 + $0x8] sm:$0xff] %v68_v28 }
 0x137   :  { %135 = shalt.err (!%p132_p12)
}
 0x138   :  { %s136_s5 = scalar_lea.hbm %s220_s2, 256 }
 0x139   :  { %p137_p13 = scmp.ne.s32.totalorder %s220_s2, %s136_s5  ;;  %p140_p0 = scmp.lt.u32.totalorder %s136_s5, %s220_s2 }
 0x13b   :  { %p142_p1 = pnand %p140_p0, %p137_p13 }
 0x13d   :  { %145 = shalt.err (!%p142_p1)
}
 0x13e   :  { %82 = dma.vmem_to_hbm [thread:$0]  %s77_s30, 256, %s220_s2, [#allocation4], %s151_s22, %s151_s22, %s152_s23  }
 0x13f   :  { %148 = dma.done.wait [#allocation4], 256  }
 0x140   :  { %149 = vsyncadd [#allocation4], 4294967040 }
 0x141   :  { %90 = vsyncpa [#allocation3], 1 }
 0x142   :  { %91 = vsyncpa [#allocation4], 1 }

</bundles_post_ra>
